<compile_context>
chip_gen: v7x
topology: tpu7x:2x2x1
jax: 0.10.0
libtpu: 0.0.40
codegen_flags: <defaults>
</compile_context>

<pallas_src>
import jax
import jax.numpy as jnp
from jax.experimental import pallas as pl
from jax.experimental.pallas import tpu as pltpu


@jax.jit
def depthwise_separable_conv(x, dw_weight, dw_bias, pw_weight, pw_bias):
    """Forward of DepthwiseSeparableConv.

    x:         (N, Cin, H, W) f32
    dw_weight: (Cin, 1, 3, 3) f32   (PyTorch depthwise conv weight)
    dw_bias:   (Cin,)         f32
    pw_weight: (Cout, Cin, 1, 1) f32
    pw_bias:   (Cout,)        f32
    returns    (N, Cout, H, W) f32
    """
    N, Cin, H, W = x.shape
    Cout = pw_weight.shape[0]
    HW = H * W
    NC = N * Cin
    NO = N * Cout
    K = 9 * NC

    # Free reshape: NCHW row-major -> (N*Cin, H*W); spatial is the lane axis,
    # batch*channel is the sublane axis.
    x_flat = x.reshape(NC, HW).astype(jnp.float32)

    # --- Host-side weight folding -------------------------------------------------
    # Per-tap channel-mixing: base[o, t, c] = pw[o, c] * dw[c, t], t = kh*3 + kw.
    wp = pw_weight.reshape(Cout, Cin).astype(jnp.float32)          # [o, c]
    wd = dw_weight.reshape(Cin, 9).astype(jnp.float32)             # [c, t]
    base = wp[:, None, :] * jnp.transpose(wd)[None, :, :]          # [o, t, c]
    # Block-diagonal over batch so one MXU dot handles the whole folded batch:
    # W_bd[n*Cout+o, t*(N*Cin)+m*Cin+c] = eye[n,m] * base[o,t,c].
    eye_n = jnp.eye(N, dtype=jnp.float32)
    w_bd = jnp.einsum('nm,otc->notmc', eye_n, base).reshape(NO, K)
    # Depthwise bias passes linearly through the pointwise conv (no nonlinearity).
    b = jnp.dot(wp, dw_bias.astype(jnp.float32)) + pw_bias.astype(jnp.float32)  # (Cout,)
    bias = jnp.tile(b, (N,)).reshape(NO, 1)

    # --- Host-side boundary masks (zero padding) ----------------------------------
    taps = [(dh, dw_) for dh in (-1, 0, 1) for dw_ in (-1, 0, 1)]  # t = (dh+1)*3+(dw_+1)
    pos = jnp.arange(HW, dtype=jnp.int32)
    h_idx = pos // W
    w_idx = pos % W
    mask_rows = []
    for dh, dw_ in taps:
        m = jnp.ones((HW,), jnp.float32)
        if dh == 1:
            m = m * (h_idx < H - 1)
        elif dh == -1:
            m = m * (h_idx >= 1)
        if dw_ == 1:
            m = m * (w_idx < W - 1)
        elif dw_ == -1:
            m = m * (w_idx >= 1)
        mask_rows.append(m)
    masks = jnp.stack(mask_rows, axis=0).astype(jnp.float32)       # (9, HW)

    # --- Kernel --------------------------------------------------------------------
    def kernel(x_ref, w_ref, b_ref, m_ref, o_ref, stack_ref):
        xv = x_ref[...]                                            # (N*Cin, HW) f32
        # Build im2col stack: row block t holds tap t's rolled + boundary-masked image.
        for t, (dh, dw_) in enumerate(taps):
            s = dh * W + dw_                                       # flattened source offset
            # shifted[r, p] = xv[r, (p + s) mod HW]; wrapped elements are masked below.
            shifted = xv if s == 0 else pltpu.roll(xv, shift=(-s) % HW, axis=1)
            stack_ref[t * NC:(t + 1) * NC, :] = shifted * m_ref[t:t + 1, :]
        # Single MXU contraction over (9 taps x N x Cin) + folded bias.
        o_ref[...] = (jnp.dot(w_ref[...], stack_ref[...],
                              preferred_element_type=jnp.float32)
                      + b_ref[...]).astype(o_ref.dtype)

    out_flat = pl.pallas_call(
        kernel,
        out_shape=jax.ShapeDtypeStruct((NO, HW), jnp.float32),
        grid=(1,),
        in_specs=[
            pl.BlockSpec((NC, HW), lambda i: (0, 0)),              # folded batch input
            pl.BlockSpec((NO, K), lambda i: (0, 0)),               # block-diag folded weights
            pl.BlockSpec((NO, 1), lambda i: (0, 0)),               # folded bias
            pl.BlockSpec((9, HW), lambda i: (0, 0)),               # boundary masks
        ],
        out_specs=pl.BlockSpec((NO, HW), lambda i: (0, 0)),
        scratch_shapes=[pltpu.VMEM((K, HW), jnp.float32)],         # im2col stack
        compiler_params=pltpu.CompilerParams(
            dimension_semantics=("arbitrary",)),
    )(x_flat, w_bd, bias, masks)

    # Free reshape back to NCHW.
    return out_flat.reshape(N, Cout, H, W)


def reference(x, dw_weight, dw_bias, pw_weight, pw_bias):
    """Pure-JAX elementwise reference (exact f32, no conv/matmul lowering)."""
    N, Cin, H, W = x.shape
    Cout = pw_weight.shape[0]
    xp = jnp.pad(x, ((0, 0), (0, 0), (1, 1), (1, 1)))
    y = jnp.zeros((N, Cin, H, W), jnp.float32)
    for kh in range(3):
        for kw in range(3):
            y = y + xp[:, :, kh:kh + H, kw:kw + W] * dw_weight[None, :, 0, kh, kw][..., None, None]
    y = y + dw_bias[None, :, None, None]
    out = jnp.zeros((N, Cout, H, W), jnp.float32)
    for c in range(Cin):
        out = out + y[:, c:c + 1, :, :] * pw_weight[None, :, c, 0, 0][..., None, None]
    out = out + pw_bias[None, :, None, None]
    return out


if __name__ == "__main__":
    key = jax.random.PRNGKey(0)
    k_x, k_dw, k_db, k_pw, k_pb = jax.random.split(key, 5)

    N, Cin, H, W = 2, 4, 16, 16
    Cout = 8

    x = jax.random.normal(k_x, (N, Cin, H, W), dtype=jnp.float32)
    dw_weight = 0.2 * jax.random.normal(k_dw, (Cin, 1, 3, 3), dtype=jnp.float32)
    dw_bias = 0.1 * jax.random.normal(k_db, (Cin,), dtype=jnp.float32)
    pw_weight = 0.2 * jax.random.normal(k_pw, (Cout, Cin, 1, 1), dtype=jnp.float32)
    pw_bias = 0.1 * jax.random.normal(k_pb, (Cout,), dtype=jnp.float32)

    out = depthwise_separable_conv(x, dw_weight, dw_bias, pw_weight, pw_bias)
    out = jax.block_until_ready(out)

    ref = reference(x, dw_weight, dw_bias, pw_weight, pw_bias)
    assert out.shape == (N, Cout, H, W)
    max_err = float(jnp.max(jnp.abs(out - ref)))
    assert jnp.allclose(out, ref, atol=1e-4, rtol=1e-4), f"mismatch vs reference (max |err|={max_err})"

    print("KERNEL_OK")
</pallas_src>

<mosaic_0001>
module attributes {stable_mosaic.version = 11 : i64} {
  func.func @kernel(%arg0: i32, %arg1: memref<8x256xf32, #tpu.memory_space<vmem>>, %arg2: memref<16x72xf32, #tpu.memory_space<vmem>>, %arg3: memref<16x1xf32, #tpu.memory_space<vmem>>, %arg4: memref<9x256xf32, #tpu.memory_space<vmem>>, %arg5: memref<16x256xf32, #tpu.memory_space<vmem>>, %arg6: memref<72x256xf32, #tpu.memory_space<vmem>>) attributes {dimension_semantics = [#tpu.dimension_semantics<arbitrary>], iteration_bounds = array<i64: 1>, scalar_prefetch = 0 : i64, scratch_operands = 1 : i64, tpu.core_type = #tpu.core_type<tc>, window_params = [{pipeline_mode = #tpu.pipeline_mode<synchronous>, transform_indices = @transform_0, window_bounds = array<i64: 8, 256>}, {pipeline_mode = #tpu.pipeline_mode<synchronous>, transform_indices = @transform_1, window_bounds = array<i64: 16, 72>}, {pipeline_mode = #tpu.pipeline_mode<synchronous>, transform_indices = @transform_2, window_bounds = array<i64: 16, 1>}, {pipeline_mode = #tpu.pipeline_mode<synchronous>, transform_indices = @transform_3, window_bounds = array<i64: 9, 256>}, {pipeline_mode = #tpu.pipeline_mode<synchronous>, transform_indices = @transform_4, window_bounds = array<i64: 16, 256>}]} {
    %c0 = arith.constant 0 : index
    %c0_0 = arith.constant 0 : index
    %0 = vector.load %arg1[%c0, %c0_0] : memref<8x256xf32, #tpu.memory_space<vmem>>, vector<8x256xf32>
    %c17_i32 = arith.constant 17 : i32
    %1 = tpu.dynamic_rotate %0 by %c17_i32 dim 1 : vector<8x256xf32>, i32 -> vector<8x256xf32>
    %c0_1 = arith.constant 0 : index
    %c0_2 = arith.constant 0 : index
    %2 = vector.load %arg4[%c0_1, %c0_2] : memref<9x256xf32, #tpu.memory_space<vmem>>, vector<1x256xf32>
    %3 = vector.broadcast %2 : vector<1x256xf32> to vector<8x256xf32>
    %4 = arith.mulf %1, %3 : vector<8x256xf32>
    %c0_3 = arith.constant 0 : index
    %c0_4 = arith.constant 0 : index
    %5 = vector.load %arg6[%c0_3, %c0_4] : memref<72x256xf32, #tpu.memory_space<vmem>>, vector<8x256xf32>
    tpu.vector_store %arg6[%c0_3, %c0_4], %4 {strides = array<i32>} : memref<72x256xf32, #tpu.memory_space<vmem>>, vector<8x256xf32>,
    %c16_i32 = arith.constant 16 : i32
    %6 = tpu.dynamic_rotate %0 by %c16_i32 dim 1 : vector<8x256xf32>, i32 -> vector<8x256xf32>
    %c1 = arith.constant 1 : index
    %c0_5 = arith.constant 0 : index
    %7 = vector.load %arg4[%c1, %c0_5] : memref<9x256xf32, #tpu.memory_space<vmem>>, vector<1x256xf32>
    %8 = vector.broadcast %7 : vector<1x256xf32> to vector<8x256xf32>
    %9 = arith.mulf %6, %8 : vector<8x256xf32>
    %c8 = arith.constant 8 : index
    %c0_6 = arith.constant 0 : index
    %10 = vector.load %arg6[%c8, %c0_6] : memref<72x256xf32, #tpu.memory_space<vmem>>, vector<8x256xf32>
    tpu.vector_store %arg6[%c8, %c0_6], %9 {strides = array<i32>} : memref<72x256xf32, #tpu.memory_space<vmem>>, vector<8x256xf32>,
    %c15_i32 = arith.constant 15 : i32
    %11 = tpu.dynamic_rotate %0 by %c15_i32 dim 1 : vector<8x256xf32>, i32 -> vector<8x256xf32>
    %c2 = arith.constant 2 : index
    %c0_7 = arith.constant 0 : index
    %12 = vector.load %arg4[%c2, %c0_7] : memref<9x256xf32, #tpu.memory_space<vmem>>, vector<1x256xf32>
    %13 = vector.broadcast %12 : vector<1x256xf32> to vector<8x256xf32>
    %14 = arith.mulf %11, %13 : vector<8x256xf32>
    %c16 = arith.constant 16 : index
    %c0_8 = arith.constant 0 : index
    %15 = vector.load %arg6[%c16, %c0_8] : memref<72x256xf32, #tpu.memory_space<vmem>>, vector<8x256xf32>
    tpu.vector_store %arg6[%c16, %c0_8], %14 {strides = array<i32>} : memref<72x256xf32, #tpu.memory_space<vmem>>, vector<8x256xf32>,
    %c1_i32 = arith.constant 1 : i32
    %16 = tpu.dynamic_rotate %0 by %c1_i32 dim 1 : vector<8x256xf32>, i32 -> vector<8x256xf32>
    %c3 = arith.constant 3 : index
    %c0_9 = arith.constant 0 : index
    %17 = vector.load %arg4[%c3, %c0_9] : memref<9x256xf32, #tpu.memory_space<vmem>>, vector<1x256xf32>
    %18 = vector.broadcast %17 : vector<1x256xf32> to vector<8x256xf32>
    %19 = arith.mulf %16, %18 : vector<8x256xf32>
    %c24 = arith.constant 24 : index
    %c0_10 = arith.constant 0 : index
    %20 = vector.load %arg6[%c24, %c0_10] : memref<72x256xf32, #tpu.memory_space<vmem>>, vector<8x256xf32>
    tpu.vector_store %arg6[%c24, %c0_10], %19 {strides = array<i32>} : memref<72x256xf32, #tpu.memory_space<vmem>>, vector<8x256xf32>,
    %c4 = arith.constant 4 : index
    %c0_11 = arith.constant 0 : index
    %21 = vector.load %arg4[%c4, %c0_11] : memref<9x256xf32, #tpu.memory_space<vmem>>, vector<1x256xf32>
    %22 = vector.broadcast %21 : vector<1x256xf32> to vector<8x256xf32>
    %23 = arith.mulf %0, %22 : vector<8x256xf32>
    %c32 = arith.constant 32 : index
    %c0_12 = arith.constant 0 : index
    %24 = vector.load %arg6[%c32, %c0_12] : memref<72x256xf32, #tpu.memory_space<vmem>>, vector<8x256xf32>
    tpu.vector_store %arg6[%c32, %c0_12], %23 {strides = array<i32>} : memref<72x256xf32, #tpu.memory_space<vmem>>, vector<8x256xf32>,
    %c255_i32 = arith.constant 255 : i32
    %25 = tpu.dynamic_rotate %0 by %c255_i32 dim 1 : vector<8x256xf32>, i32 -> vector<8x256xf32>
    %c5 = arith.constant 5 : index
    %c0_13 = arith.constant 0 : index
    %26 = vector.load %arg4[%c5, %c0_13] : memref<9x256xf32, #tpu.memory_space<vmem>>, vector<1x256xf32>
    %27 = vector.broadcast %26 : vector<1x256xf32> to vector<8x256xf32>
    %28 = arith.mulf %25, %27 : vector<8x256xf32>
    %c40 = arith.constant 40 : index
    %c0_14 = arith.constant 0 : index
    %29 = vector.load %arg6[%c40, %c0_14] : memref<72x256xf32, #tpu.memory_space<vmem>>, vector<8x256xf32>
    tpu.vector_store %arg6[%c40, %c0_14], %28 {strides = array<i32>} : memref<72x256xf32, #tpu.memory_space<vmem>>, vector<8x256xf32>,
    %c241_i32 = arith.constant 241 : i32
    %30 = tpu.dynamic_rotate %0 by %c241_i32 dim 1 : vector<8x256xf32>, i32 -> vector<8x256xf32>
    %c6 = arith.constant 6 : index
    %c0_15 = arith.constant 0 : index
    %31 = vector.load %arg4[%c6, %c0_15] : memref<9x256xf32, #tpu.memory_space<vmem>>, vector<1x256xf32>
    %32 = vector.broadcast %31 : vector<1x256xf32> to vector<8x256xf32>
    %33 = arith.mulf %30, %32 : vector<8x256xf32>
    %c48 = arith.constant 48 : index
    %c0_16 = arith.constant 0 : index
    %34 = vector.load %arg6[%c48, %c0_16] : memref<72x256xf32, #tpu.memory_space<vmem>>, vector<8x256xf32>
    tpu.vector_store %arg6[%c48, %c0_16], %33 {strides = array<i32>} : memref<72x256xf32, #tpu.memory_space<vmem>>, vector<8x256xf32>,
    %c240_i32 = arith.constant 240 : i32
    %35 = tpu.dynamic_rotate %0 by %c240_i32 dim 1 : vector<8x256xf32>, i32 -> vector<8x256xf32>
    %c7 = arith.constant 7 : index
    %c0_17 = arith.constant 0 : index
    %36 = vector.load %arg4[%c7, %c0_17] : memref<9x256xf32, #tpu.memory_space<vmem>>, vector<1x256xf32>
    %37 = vector.broadcast %36 : vector<1x256xf32> to vector<8x256xf32>
    %38 = arith.mulf %35, %37 : vector<8x256xf32>
    %c56 = arith.constant 56 : index
    %c0_18 = arith.constant 0 : index
    %39 = vector.load %arg6[%c56, %c0_18] : memref<72x256xf32, #tpu.memory_space<vmem>>, vector<8x256xf32>
    tpu.vector_store %arg6[%c56, %c0_18], %38 {strides = array<i32>} : memref<72x256xf32, #tpu.memory_space<vmem>>, vector<8x256xf32>,
    %c239_i32 = arith.constant 239 : i32
    %40 = tpu.dynamic_rotate %0 by %c239_i32 dim 1 : vector<8x256xf32>, i32 -> vector<8x256xf32>
    %c8_19 = arith.constant 8 : index
    %c0_20 = arith.constant 0 : index
    %41 = vector.load %arg4[%c8_19, %c0_20] : memref<9x256xf32, #tpu.memory_space<vmem>>, vector<1x256xf32>
    %42 = vector.broadcast %41 : vector<1x256xf32> to vector<8x256xf32>
    %43 = arith.mulf %40, %42 : vector<8x256xf32>
    %c64 = arith.constant 64 : index
    %c0_21 = arith.constant 0 : index
    %44 = vector.load %arg6[%c64, %c0_21] : memref<72x256xf32, #tpu.memory_space<vmem>>, vector<8x256xf32>
    tpu.vector_store %arg6[%c64, %c0_21], %43 {strides = array<i32>} : memref<72x256xf32, #tpu.memory_space<vmem>>, vector<8x256xf32>,
    %c0_22 = arith.constant 0 : index
    %c0_23 = arith.constant 0 : index
    %45 = vector.load %arg2[%c0_22, %c0_23] : memref<16x72xf32, #tpu.memory_space<vmem>>, vector<16x72xf32>
    %c0_24 = arith.constant 0 : index
    %c0_25 = arith.constant 0 : index
    %46 = vector.load %arg6[%c0_24, %c0_25] : memref<72x256xf32, #tpu.memory_space<vmem>>, vector<72x256xf32>
    %cst = arith.constant dense<0.000000e+00> : vector<16x256xf32>
    %47 = tpu.matmul %45, %46, %cst {dimension_numbers = #tpu.dot_dimension_numbers<[1], [0], [0], [1], [0, 0, 1, 1], [], []>} : vector<16x72xf32>, vector<72x256xf32>, vector<16x256xf32> -> vector<16x256xf32>
    %c0_26 = arith.constant 0 : index
    %c0_27 = arith.constant 0 : index
    %48 = vector.load %arg3[%c0_26, %c0_27] : memref<16x1xf32, #tpu.memory_space<vmem>>, vector<16x1xf32>
    %49 = vector.broadcast %48 : vector<16x1xf32> to vector<16x256xf32>
    %50 = arith.addf %47, %49 : vector<16x256xf32>
    %c0_28 = arith.constant 0 : index
    %c0_29 = arith.constant 0 : index
    %51 = vector.load %arg5[%c0_28, %c0_29] : memref<16x256xf32, #tpu.memory_space<vmem>>, vector<16x256xf32>
    tpu.vector_store %arg5[%c0_28, %c0_29], %50 {strides = array<i32>} : memref<16x256xf32, #tpu.memory_space<vmem>>, vector<16x256xf32>,
    return
  }
  func.func @transform_0(%arg0: i32) -> (i32, i32) {
    %c0_i32 = arith.constant 0 : i32
    %c0_i32_0 = arith.constant 0 : i32
    %c0_i32_1 = arith.constant 0 : i32
    return %c0_i32, %c0_i32_0 : i32, i32
  }
  func.func @transform_1(%arg0: i32) -> (i32, i32) {
    %c0_i32 = arith.constant 0 : i32
    %c0_i32_0 = arith.constant 0 : i32
    %c0_i32_1 = arith.constant 0 : i32
    return %c0_i32, %c0_i32_0 : i32, i32
  }
  func.func @transform_2(%arg0: i32) -> (i32, i32) {
    %c0_i32 = arith.constant 0 : i32
    %c0_i32_0 = arith.constant 0 : i32
    %c0_i32_1 = arith.constant 0 : i32
    return %c0_i32, %c0_i32_0 : i32, i32
  }
  func.func @transform_3(%arg0: i32) -> (i32, i32) {
    %c0_i32 = arith.constant 0 : i32
    %c0_i32_0 = arith.constant 0 : i32
    %c0_i32_1 = arith.constant 0 : i32
    return %c0_i32, %c0_i32_0 : i32, i32
  }
  func.func @transform_4(%arg0: i32) -> (i32, i32) {
    %c0_i32 = arith.constant 0 : i32
    %c0_i32_0 = arith.constant 0 : i32
    %c0_i32_1 = arith.constant 0 : i32
    return %c0_i32, %c0_i32_0 : i32, i32
  }
}

</mosaic_0001>

<bundles_post_ra>
// kernel: tile.8
= control target key start
LH: loop header
LB: loop body
LE: loop exit
PB: predicated region body
PF: predicated region fallthrough
CT: control target
= control target key end

     0   :  { %s22_s0 = inlined_call_operand.vmem [shape: f32[8], index: 0, kind: input, shape index: {}]   ;;  %s23_s1 = inlined_call_operand.vmem [shape: f32[2,8], index: 1, kind: output, shape index: {}]  }
   0x1   :  { %v4_v0 = vld [vmem:[%s22_s0] ss:$0 sm:$0xff] }
   0x2   :  { %5 = vst [vmem:[%s23_s1] sm:$0x3] %v4_v0 }

// kernel: tile.0
= control target key start
LH: loop header
LB: loop body
LE: loop exit
PB: predicated region body
PF: predicated region fallthrough
CT: control target
= control target key end

     0   :  { %s66_s8 = smov 125   ;;  %vm7_vm0 = vcmask 7168   ;;  %s67_s11 = smov 126   ;;  %s117_s0 = inlined_call_operand.vmem [shape: f32[2,8], index: 0, kind: input, shape index: {}]   ;;  %s118_s1 = inlined_call_operand.vmem [shape: f32[16,1], index: 1, kind: output, shape index: {}]  }
   0x1   :  { %v4_v0 = vld [vmem:[%s117_s0] sm:$0x3]  ;;  %s65_s0 = smov 127   ;;  %s68_s12 = smov 124  }
   0x2   :  { %5 = vst [vmem:[#allocation0] sm:$0x3] %v4_v0  ;;  %s69_s13 = smov 123   ;;  %s70_s14 = smov 122  }
   0x3   :  { %s71_s15 = smov 121  }
   0x9   :  { %v9_v1 = vld [vmem:[#allocation0] sm:$0x3]  }
   0xa   :  { %v21_v2 = vld [vmem:[#allocation0] sm:$0x3]   ;;  %10 = vrot.lane.b32.xlu0 %v9_v1, %s65_s0 }
   0xb   :  { %22 = vrot.lane.b32.xlu1 %v21_v2, %s66_s8  ;;  %v15_v3 = vld [vmem:[#allocation0] sm:$0x3]  }
   0xc   :  { %v27_v4 = vld [vmem:[#allocation0] sm:$0x3]  }
   0xd   :  { %v6_v5 = vld [vmem:[#allocation0] sm:$0x3]  }
   0xe   :  { %8 = vst.msk [vmem:[%s118_s1] ss:$8 sm:$0x3] %vm7_vm0, %v6_v5   ;;  %16 = vrot.lane.b32.xlu0 %v15_v3, %s67_s11  ;;  %v33_v6 = vld [vmem:[#allocation0] sm:$0x3]  }
   0xf   :  { %28 = vrot.lane.b32.xlu1 %v27_v4, %s68_s12  ;;  %v39_v7 = vld [vmem:[#allocation0] sm:$0x3]  }
  0x10   :  { %v45_v8 = vld [vmem:[#allocation0] sm:$0x3]  }
  0x12   :  { %34 = vrot.lane.b32.xlu0 %v33_v6, %s69_s13 }
  0x13   :  { %40 = vrot.lane.b32.xlu1 %v39_v7, %s70_s14 }
  0x16   :  { %46 = vrot.lane.b32.xlu0 %v45_v8, %s71_s15 }
  0x7c   :  { %v11_v9 = vpop.permute.xlu0 %10  }
  0x7d   :  { %v23_v10 = vpop.permute.xlu1 %22   ;;  %51 = vst.msk [vmem:[%s118_s1 + $0x1] ss:$8 sm:$0x3] %vm7_vm0, %v11_v9  }
  0x7e   :  { %53 = vst.msk [vmem:[%s118_s1 + $0x3] ss:$8 sm:$0x3] %vm7_vm0, %v23_v10  }
  0x80   :  { %v17_v11 = vpop.permute.xlu0 %16  }
  0x81   :  { %v29_v12 = vpop.permute.xlu1 %28   ;;  %52 = vst.msk [vmem:[%s118_s1 + $0x2] ss:$8 sm:$0x3] %vm7_vm0, %v17_v11  }
  0x82   :  { %54 = vst.msk [vmem:[%s118_s1 + $0x4] ss:$8 sm:$0x3] %vm7_vm0, %v29_v12  }
  0x84   :  { %v35_v13 = vpop.permute.xlu0 %34  }
  0x85   :  { %v41_v14 = vpop.permute.xlu1 %40   ;;  %55 = vst.msk [vmem:[%s118_s1 + $0x5] ss:$8 sm:$0x3] %vm7_vm0, %v35_v13  }
  0x86   :  { %56 = vst.msk [vmem:[%s118_s1 + $0x6] ss:$8 sm:$0x3] %vm7_vm0, %v41_v14  }
  0x88   :  { %v47_v15 = vpop.permute.xlu0 %46  }
  0x89   :  { %57 = vst.msk [vmem:[%s118_s1 + $0x7] ss:$8 sm:$0x3] %vm7_vm0, %v47_v15  }

// kernel: depthwise_separable_conv.1
= control target key start
LH: loop header
LB: loop body
LE: loop exit
PB: predicated region body
PF: predicated region fallthrough
CT: control target
= control target key end

     0   :  { %s401_s17 = smov 16   ;;  %s402_s18 = smov 17   ;;  %v407_v2 = vmov 0.0   ;;  %v408_v3 = vmov 0   ;;  %v23_v6 = vlaneseq  ;;  %vm261_vm8 = vcmask 588800   ;;  %s551_s0 = inlined_call_operand.vmem [shape: f32[8,256], index: 0, kind: input, shape index: {}]   ;;  %s552_s2 = inlined_call_operand.vmem [shape: f32[16,1], index: 2, kind: input, shape index: {}]   ;;  %s553_s3 = inlined_call_operand.vmem [shape: f32[9,256], index: 3, kind: input, shape index: {}]   ;;  %s554_s1 = inlined_call_operand.vmem [shape: f32[16,72], index: 1, kind: input, shape index: {}]   ;;  %s555_s4 = inlined_call_operand.vmem [shape: f32[16,256], index: 4, kind: output, shape index: {}]  }
   0x1   :  { %v439_v0 = vld [vmem:[%s551_s0] sm:$0xff]  ;;  %v446_v1 = vld [vmem:[%s551_s0 + $0x8] sm:$0xff]  ;;  %s403_s21 = smov 15   ;;  %s404_s22 = smov 1   ;;  %332 = vmatprep.mubr.f32.mxu0 %v407_v2  ;;  %338 = vmatprep.mubr.f32.mxu1 %v407_v2 }
   0x2   :  { %44 = vrot.lane.b32.xlu1 %v439_v0, %s401_s17  ;;  %19 = vrot.lane.b32.xlu0 %v439_v0, %s402_s18  ;;  %s405_s23 = smov 127   ;;  %s406_s0 = smov 113   ;;  %v250_v4 = vld [vmem:[%s552_s2 + $0x8] sm:$0xff]  ;;  %v249_v5 = vld [vmem:[%s552_s2] sm:$0xff]  ;;  %v31_v7 = vshrl.u32 %v23_v6, 7  ;;  %v468_v8 = vand.u32 127, %v23_v6 }
   0x3   :  { %400 = vset.pattern.permute.xlu1 %v408_v3  ;;  %399 = vset.pattern.permute.xlu0 %v408_v3  ;;  %s409_s24 = smov 112   ;;  %s410_s25 = smov 111   ;;  %v353_v11 = vld [vmem:[%s553_s3 + $0x1] ss:$8 sm:$0x3] }
   0x4   :  { %v470_v9 = vsub.s32 0, %v31_v7  ;;  %v472_v10 = vsub.s32 1, %v31_v7  ;;  %v28_v12 = vld [vmem:[%s553_s3] ss:$8 sm:$0x3]  ;;  %vm48_vm0 = vcmp.lt.s32.totalorder %v468_v8, 16 }
   0x5   :  { %vm25_vm1 = vcmp.lt.s32.totalorder %v468_v8, 17  ;;  %v354_v29 = vld [vmem:[%s553_s3 + $0x2] ss:$8 sm:$0x3]  ;;  %vm72_vm2 = vcmp.lt.s32.totalorder %v468_v8, 15  ;;  %vm96_vm3 = vcmp.lt.s32.totalorder %v468_v8, 1 }
   0x6   :  { %46 = vrot.lane.b32.xlu1 %v446_v1, %s401_s17  ;;  %21 = vrot.lane.b32.xlu0 %v446_v1, %s402_s18  ;;  %v57_v15 = vrot.slane %v353_v11, %v470_v9  ;;  %v61_v16 = vrot.slane %v353_v11, %v472_v10  ;;  %v33_v17 = vrot.slane %v28_v12, %v470_v9  ;;  %v355_v30 = vld [vmem:[%s553_s3 + $0x3] ss:$8 sm:$0x3]  ;;  %v356_v36 = vld [vmem:[%s553_s3 + $0x4] ss:$8 sm:$0x3] }
   0x7   :  { %v37_v18 = vrot.slane %v28_v12, %v472_v10  ;;  %v81_v35 = vrot.slane %v354_v29, %v470_v9  ;;  %v85_v37 = vrot.slane %v354_v29, %v472_v10  ;;  %v105_v38 = vrot.slane %v355_v30, %v470_v9  ;;  %v357_v40 = vld [vmem:[%s553_s3 + $0x5] ss:$8 sm:$0x3]  ;;  %v358_v3 = vld [vmem:[%s553_s3 + $0x6] ss:$8 sm:$0x3] }
   0x8   :  { %v109_v39 = vrot.slane %v355_v30, %v472_v10  ;;  %vm137_vm4 = vcmp.lt.s32.totalorder %v468_v8, 127  ;;  %v126_v45 = vrot.slane %v356_v36, %v472_v10  ;;  %v122_v46 = vrot.slane %v356_v36, %v470_v9 }
   0x9   :  { %v146_v49 = vrot.slane %v357_v40, %v470_v9  ;;  %v150_v50 = vrot.slane %v357_v40, %v472_v10  ;;  %vm161_vm5 = vcmp.lt.s32.totalorder %v468_v8, 113  ;;  %v170_v7 = vrot.slane %v358_v3, %v470_v9 }
   0xa   :  { %70 = vrot.lane.b32.xlu1 %v446_v1, %s403_s21  ;;  %68 = vrot.lane.b32.xlu0 %v439_v0, %s403_s21  ;;  %v130_v59 = vmul.f32 %v126_v45, %v446_v1  ;;  %v129_v60 = vmul.f32 %v122_v46, %v439_v0  ;;  %v174_v11 = vrot.slane %v358_v3, %v472_v10  ;;  %vm185_vm6 = vcmp.lt.s32.totalorder %v468_v8, 112 }
   0xb   :  { %vm209_vm7 = vcmp.lt.s32.totalorder %v468_v8, 111  ;;  %v229_v8 = vld [vmem:[%s554_s1] sm:$0xff] }
   0xe   :  { %94 = vrot.lane.b32.xlu1 %v446_v1, %s404_s22  ;;  %92 = vrot.lane.b32.xlu0 %v439_v0, %s404_s22 }
  0x12   :  { %135 = vrot.lane.b32.xlu1 %v446_v1, %s405_s23  ;;  %133 = vrot.lane.b32.xlu0 %v439_v0, %s405_s23 }
  0x16   :  { %159 = vrot.lane.b32.xlu1 %v446_v1, %s406_s0  ;;  %157 = vrot.lane.b32.xlu0 %v439_v0, %s406_s0 }
  0x1a   :  { %183 = vrot.lane.b32.xlu1 %v446_v1, %s409_s24  ;;  %181 = vrot.lane.b32.xlu0 %v439_v0, %s409_s24 }
  0x1e   :  { %207 = vrot.lane.b32.xlu1 %v446_v1, %s410_s25  ;;  %205 = vrot.lane.b32.xlu0 %v439_v0, %s410_s25  ;;  %v359_v0 = vld [vmem:[%s553_s3 + $0x7] ss:$8 sm:$0x3] }
  0x1f   :  { %v194_v12 = vrot.slane %v359_v0, %v470_v9 }
  0x22   :  { %258 = vperm.xlu1 %400, %v250_v4   ;;  %253 = vperm.xlu0 %399, %v249_v5  }
  0x74   :  { %v45_v13 = vpop.permute.xlu1 %44  ;;  %v20_v14 = vpop.permute.xlu0 %19 }
  0x78   :  { %v47_v19 = vpop.permute.xlu1 %46  ;;  %v22_v20 = vpop.permute.xlu0 %21 }
  0x79   :  { %v49_v21 = vsel %vm48_vm0, %v45_v13, %v47_v19  ;;  %v50_v22 = vsel %vm48_vm0, %v47_v19, %v45_v13  ;;  %v26_v23 = vsel %vm25_vm1, %v20_v14, %v22_v20  ;;  %v27_v24 = vsel %vm25_vm1, %v22_v20, %v20_v14  ;;  %v360_v14 = vld [vmem:[%s553_s3 + $0x10] ss:$8 sm:$0x3] }
  0x7a   :  { %v64_v25 = vmul.f32 %v57_v15, %v50_v22  ;;  %v65_v26 = vmul.f32 %v61_v16, %v49_v21  ;;  %v40_v27 = vmul.f32 %v33_v17, %v27_v24  ;;  %v41_v28 = vmul.f32 %v37_v18, %v26_v23 }
  0x7b   :  { %v198_v13 = vrot.slane %v359_v0, %v472_v10  ;;  %v222_v21 = vrot.slane %v360_v14, %v472_v10 }
  0x7c   :  { %v71_v31 = vpop.permute.xlu1 %70  ;;  %v69_v32 = vpop.permute.xlu0 %68  ;;  %v363_v33 = vpack.c.bf16 %v65_v26, %v41_v28  ;;  %v365_v34 = vpack.c.bf16 %v64_v25, %v40_v27  ;;  %v218_v26 = vrot.slane %v360_v14, %v470_v9  ;;  %v230_v9 = vld [vmem:[%s554_s1 + $0x8] sm:$0xff] }
  0x7d   :  { %v73_v41 = vsel %vm72_vm2, %v69_v32, %v71_v31  ;;  %v74_v42 = vsel %vm72_vm2, %v71_v31, %v69_v32 }
  0x7e   :  { %364 = vmatprep.subr.bf16.mxu0 %v363_v33  ;;  %379 = vmatprep.subr.bf16.mxu1 %v363_v33  ;;  %v88_v51 = vmul.f32 %v81_v35, %v74_v42  ;;  %v89_v52 = vmul.f32 %v85_v37, %v73_v41 }
  0x7f   :  { %366 = vmatpush1.bf16.msra.mxu0 %v365_v34  ;;  %384 = vmatpush1.bf16.msra.mxu1 %v365_v34 }
  0x80   :  { %v95_v43 = vpop.permute.xlu1 %94  ;;  %v93_v44 = vpop.permute.xlu0 %92 }
  0x81   :  { %v97_v47 = vsel %vm96_vm3, %v93_v44, %v95_v43  ;;  %v98_v48 = vsel %vm96_vm3, %v95_v43, %v93_v44 }
  0x82   :  { %v112_v53 = vmul.f32 %v105_v38, %v98_v48  ;;  %v113_v54 = vmul.f32 %v109_v39, %v97_v47 }
  0x84   :  { %v136_v55 = vpop.permute.xlu1 %135  ;;  %v134_v56 = vpop.permute.xlu0 %133  ;;  %v367_v57 = vpack.c.bf16 %v113_v54, %v89_v52  ;;  %v369_v58 = vpack.c.bf16 %v112_v53, %v88_v51 }
  0x85   :  { %v138_v61 = vsel %vm137_vm4, %v134_v56, %v136_v55  ;;  %v139_v62 = vsel %vm137_vm4, %v136_v55, %v134_v56 }
  0x86   :  { %v153_v63 = vmul.f32 %v146_v49, %v138_v61  ;;  %v154_v2 = vmul.f32 %v150_v50, %v139_v62  ;;  %368 = vmatprep.subr.bf16.mxu0 %v367_v57  ;;  %380 = vmatprep.subr.bf16.mxu1 %v367_v57 }
  0x87   :  { %370 = vmatpush1.bf16.msra.mxu0 %v369_v58  ;;  %385 = vmatpush1.bf16.msra.mxu1 %v369_v58 }
  0x88   :  { %v160_v1 = vpop.permute.xlu1 %159  ;;  %v158_v4 = vpop.permute.xlu0 %157  ;;  %v371_v5 = vpack.c.bf16 %v154_v2, %v130_v59  ;;  %v373_v6 = vpack.c.bf16 %v153_v63, %v129_v60 }
  0x89   :  { %v162_v15 = vsel %vm161_vm5, %v158_v4, %v160_v1  ;;  %v163_v16 = vsel %vm161_vm5, %v160_v1, %v158_v4 }
  0x8a   :  { %372 = vmatprep.subr.bf16.mxu0 %v371_v5  ;;  %381 = vmatprep.subr.bf16.mxu1 %v371_v5  ;;  %v177_v22 = vmul.f32 %v170_v7, %v162_v15  ;;  %v178_v23 = vmul.f32 %v174_v11, %v163_v16 }
  0x8b   :  { %374 = vmatpush1.bf16.msra.mxu0 %v373_v6  ;;  %386 = vmatpush1.bf16.msra.mxu1 %v373_v6 }
  0x8c   :  { %v184_v17 = vpop.permute.xlu1 %183  ;;  %v182_v18 = vpop.permute.xlu0 %181 }
  0x8d   :  { %v186_v19 = vsel %vm185_vm6, %v182_v18, %v184_v17  ;;  %v187_v20 = vsel %vm185_vm6, %v184_v17, %v182_v18 }
  0x8e   :  { %v201_v24 = vmul.f32 %v194_v12, %v186_v19  ;;  %v202_v25 = vmul.f32 %v198_v13, %v187_v20 }
  0x90   :  { %v208_v27 = vpop.permute.xlu1 %207  ;;  %v206_v28 = vpop.permute.xlu0 %205  ;;  %v375_v29 = vpack.c.bf16 %v202_v25, %v178_v23  ;;  %v377_v30 = vpack.c.bf16 %v201_v24, %v177_v22 }
  0x91   :  { %v210_v31 = vsel %vm209_vm7, %v206_v28, %v208_v27  ;;  %v211_v32 = vsel %vm209_vm7, %v208_v27, %v206_v28 }
  0x92   :  { %v226_v33 = vmul.f32 %v222_v21, %v211_v32  ;;  %376 = vmatprep.subr.bf16.mxu0 %v375_v29  ;;  %382 = vmatprep.subr.bf16.mxu1 %v375_v29  ;;  %v225_v34 = vmul.f32 %v218_v26, %v210_v31 }
  0x93   :  { %378 = vmatpush1.bf16.msra.mxu0 %v377_v30  ;;  %387 = vmatpush1.bf16.msra.mxu1 %v377_v30 }
  0x94   :  { %284 = vmatprep.subr.mxu0 %v226_v33  ;;  %383 = vmatprep.subr.mxu1 %v226_v33 }
  0x97   :  { %285 = vmatpush1.msra.mxu0 %v225_v34  ;;  %388 = vmatpush1.msra.mxu1 %v225_v34 }
  0x98   :  { %361 = vmatmul.mubr.msk.f32.vlgmr.msra.gmra.mrb[0].mxu0 %vm261_vm8, %v229_v8  ;;  %362 = vmatmul.mubr.msk.f32.vlgmr.msra.gmra.mrb[0].mxu1 %vm261_vm8, %v230_v9 }
  0xa1   :  { %v259_v10 = vpop.permute.xlu1 %258  ;;  %v254_v35 = vpop.permute.xlu0 %253 }
 0x16b   :  { %v334_v36 = vpop.f32.mrb[0].mxu0  ;;  %v340_v37 = vpop.f32.mrb[0].mxu1 }
 0x16c   :  { %v335_v38 = vadd.f32 %v334_v36, %v254_v35  ;;  %v341_v39 = vadd.f32 %v340_v37, %v259_v10  ;;  %v336_v40 = vpop.f32.mrb[1].mxu0  ;;  %v342_v41 = vpop.f32.mrb[1].mxu1 }
 0x16d   :  { %v337_v42 = vadd.f32 %v336_v40, %v254_v35  ;;  %v343_v43 = vadd.f32 %v342_v41, %v259_v10 }
 0x16e   :  { %345 = vst [vmem:[%s555_s4] sm:$0xff] %v335_v38  ;;  %347 = vst [vmem:[%s555_s4 + $0x10] sm:$0xff] %v341_v39 }
 0x16f   :  { %346 = vst [vmem:[%s555_s4 + $0x8] sm:$0xff] %v337_v42  ;;  %348 = vst [vmem:[%s555_s4 + $0x18] sm:$0xff] %v343_v43 }

</bundles_post_ra>
